<compile_context>
chip_gen: v6e
topology: v6e:2x2x1
jax: 0.10.0
libtpu: 0.0.40
codegen_flags: <defaults>
</compile_context>

<pallas_src>
import functools

import jax
import jax.numpy as jnp
from jax.experimental import pallas as pl
from jax.experimental.pallas import tpu as pltpu


def _att_pool_kernel(att_ref, seg_ref, p_ref, out_ref):
    # att_ref: (B, t_a, HW)  (t_a == t, or 1 for temporally-broadcast attmap)
    # seg_ref: (B, t,  HW)
    # p_ref:   (HW, Hh*Wh)  constant; folds (1/t) * 2x2-average pooling
    # out_ref: (1, B, Hh*Wh)
    att = att_ref[...].astype(jnp.float32)
    seg = seg_ref[...].astype(jnp.float32)

    # Fused elementwise: attmap*segment + segment == (attmap + 1) * segment,
    # broadcasting over t if attmap is (B, 1, HW).  f32 accumulation.
    x = (att + 1.0) * seg                        # (B, t, HW), f32

    # Temporal sum (the 1/t factor lives inside P).
    xt = jnp.sum(x, axis=1)                      # (B, HW), f32

    # Temporal-mean + 2x2 spatial average pool as a single MXU matmul.
    pooled = jnp.dot(xt, p_ref[...], preferred_element_type=jnp.float32)

    out_ref[...] = pooled[None].astype(out_ref.dtype)


def _pool_matrix(t, H, W):
    """(H*W, (H//2)*(W//2)) matrix: 0.25/t at each 2x2-window position."""
    Hh, Wh = H // 2, W // 2
    h = jnp.arange(H)
    w = jnp.arange(W)
    # flattened (h, w) pixel -> flattened (h//2, w//2) output window
    win = ((h[:, None] // 2) * Wh + (w[None, :] // 2)).reshape(H * W)
    p = (win[:, None] == jnp.arange(Hh * Wh)[None, :]).astype(jnp.float32)
    return p * (0.25 / float(t))


def _choose_batch(nc, slice_bytes, target_tile_bytes=2 * 1024 * 1024):
    """Largest divisor of nc with B * slice_bytes <= target, grid >= 2 if possible."""
    max_b = max(1, target_tile_bytes // max(slice_bytes, 1))
    if nc >= 2:
        # Keep at least 2 grid steps so both TensorCores on v7x get work.
        max_b = min(max_b, max(1, nc // 2))
    best = 1
    for d in range(1, nc + 1):
        if nc % d == 0 and d <= max_b:
            best = d
    return best


def attention_and_pooling(attmap, segment, *, interpret=False):
    """Pallas equivalent of AttentionAndPooling.forward.

    attmap:  broadcastable to segment's shape (N, C, t, H, W)
    segment: (N, C, t, H, W)
    returns: (N, C, 1, H//2, W//2)
    """
    N, C, t, H, W = segment.shape
    assert H % 2 == 0 and W % 2 == 0, "even H, W assumed (2x2 adaptive pool)"
    # TODO(synk): odd H/W would need true adaptive (overlapping-window) pooling.

    NC = N * C
    HW = H * W
    Hh, Wh = H // 2, W // 2
    HWo = Hh * Wh

    seg = segment.reshape(NC, t, HW)

    # Zero-copy attmap paths (no HBM materialization of the broadcast).
    if attmap.shape == segment.shape:
        att = attmap.reshape(NC, t, HW)
        t_a = t
    elif attmap.shape == (N, C, 1, H, W):
        att = attmap.reshape(NC, 1, HW)
        t_a = 1
    else:
        # TODO(synk): other broadcast patterns (e.g. channel-broadcast attmap)
        # fall back to materializing the broadcast in HBM.
        att = jnp.broadcast_to(attmap, segment.shape).reshape(NC, t, HW)
        t_a = t

    pool_mat = _pool_matrix(t, H, W)             # (HW, HWo), holds 0.25/t

    slice_bytes = t * HW * jnp.dtype(segment.dtype).itemsize
    B = _choose_batch(NC, slice_bytes)
    G = NC // B

    out = pl.pallas_call(
        _att_pool_kernel,
        out_shape=jax.ShapeDtypeStruct((G, B, HWo), segment.dtype),
        grid=(G,),
        in_specs=[
            pl.BlockSpec((B, t_a, HW), lambda i: (i, 0, 0)),
            pl.BlockSpec((B, t, HW), lambda i: (i, 0, 0)),
            # Constant block index -> fetched once, stays VMEM-resident.
            pl.BlockSpec((HW, HWo), lambda i: (0, 0)),
        ],
        out_specs=pl.BlockSpec((1, B, HWo), lambda i: (i, 0, 0)),
        compiler_params=pltpu.CompilerParams(
            dimension_semantics=("parallel",),
        ),
        interpret=interpret,
    )(att, seg, pool_mat)

    return out.reshape(N, C, 1, Hh, Wh)


def _reference(attmap, segment):
    N, C, t, H, W = segment.shape
    out = attmap * segment + segment
    out = jnp.mean(out, axis=2, keepdims=True)                     # (N,C,1,H,W)
    out = out.reshape(N, C, 1, H // 2, 2, W // 2, 2).mean(axis=(4, 6))
    return out


if __name__ == "__main__":
    key = jax.random.PRNGKey(0)
    k1, k2, k3 = jax.random.split(key, 3)

    N, C, t, H, W = 2, 4, 8, 16, 16
    segment = jax.random.normal(k1, (N, C, t, H, W), dtype=jnp.float32)
    attmap = jax.random.uniform(k2, (N, C, t, H, W), dtype=jnp.float32)

    # Full-shape attmap path.
    out = attention_and_pooling(attmap, segment)
    out = jax.block_until_ready(out)
    ref = _reference(attmap, segment)
    assert out.shape == (N, C, 1, H // 2, W // 2)
    assert jnp.allclose(out, ref, atol=1e-5, rtol=1e-5)

    # Temporally-broadcast attmap path (zero-copy, broadcast inside kernel).
    attmap_b = jax.random.uniform(k3, (N, C, 1, H, W), dtype=jnp.float32)
    out_b = attention_and_pooling(attmap_b, segment)
    out_b = jax.block_until_ready(out_b)
    ref_b = _reference(attmap_b, segment)
    assert jnp.allclose(out_b, ref_b, atol=1e-5, rtol=1e-5)

    print("KERNEL_OK")
</pallas_src>

<mosaic_0001>
module attributes {stable_mosaic.version = 11 : i64} {
  func.func @_att_pool_kernel(%arg0: i32, %arg1: memref<4x8x256xf32, #tpu.memory_space<vmem>>, %arg2: memref<4x8x256xf32, #tpu.memory_space<vmem>>, %arg3: memref<256x64xf32, #tpu.memory_space<vmem>>, %arg4: memref<1x4x64xf32, #tpu.memory_space<vmem>>) attributes {dimension_semantics = [#tpu.dimension_semantics<parallel>], iteration_bounds = array<i64: 2>, scalar_prefetch = 0 : i64, scratch_operands = 0 : i64, tpu.core_type = #tpu.core_type<tc>, window_params = [{transform_indices = @transform_0, window_bounds = array<i64: 4, 8, 256>}, {transform_indices = @transform_1, window_bounds = array<i64: 4, 8, 256>}, {pipeline_mode = #tpu.pipeline_mode<synchronous>, transform_indices = @transform_2, window_bounds = array<i64: 256, 64>}, {transform_indices = @transform_3, window_bounds = array<i64: 1, 4, 64>}]} {
    %c0 = arith.constant 0 : index
    %c0_0 = arith.constant 0 : index
    %c0_1 = arith.constant 0 : index
    %0 = vector.load %arg1[%c0, %c0_0, %c0_1] : memref<4x8x256xf32, #tpu.memory_space<vmem>>, vector<4x8x256xf32>
    %c0_2 = arith.constant 0 : index
    %c0_3 = arith.constant 0 : index
    %c0_4 = arith.constant 0 : index
    %1 = vector.load %arg2[%c0_2, %c0_3, %c0_4] : memref<4x8x256xf32, #tpu.memory_space<vmem>>, vector<4x8x256xf32>
    %cst = arith.constant 1.000000e+00 : f32
    %2 = vector.broadcast %cst : f32 to vector<4x8x256xf32>
    %3 = arith.addf %0, %2 : vector<4x8x256xf32>
    %4 = arith.mulf %3, %1 : vector<4x8x256xf32>
    %cst_5 = arith.constant dense<0.000000e+00> : vector<4x256xf32>
    %5 = vector.multi_reduction <add>, %4, %cst_5 [1] : vector<4x8x256xf32> to vector<4x256xf32>
    %c0_6 = arith.constant 0 : index
    %c0_7 = arith.constant 0 : index
    %6 = vector.load %arg3[%c0_6, %c0_7] : memref<256x64xf32, #tpu.memory_space<vmem>>, vector<256x64xf32>
    %cst_8 = arith.constant dense<0.000000e+00> : vector<4x64xf32>
    %7 = tpu.matmul %5, %6, %cst_8 {dimension_numbers = #tpu.dot_dimension_numbers<[1], [0], [0], [1], [0, 0, 1, 1], [], []>} : vector<4x256xf32>, vector<256x64xf32>, vector<4x64xf32> -> vector<4x64xf32>
    %8 = vector.shape_cast %7 : vector<4x64xf32> to vector<1x4x64xf32>
    %c0_9 = arith.constant 0 : index
    %c0_10 = arith.constant 0 : index
    %c0_11 = arith.constant 0 : index
    %9 = vector.load %arg4[%c0_9, %c0_10, %c0_11] : memref<1x4x64xf32, #tpu.memory_space<vmem>>, vector<1x4x64xf32>
    tpu.vector_store %arg4[%c0_9, %c0_10, %c0_11], %8 {strides = array<i32>} : memref<1x4x64xf32, #tpu.memory_space<vmem>>, vector<1x4x64xf32>,
    return
  }
  func.func @transform_0(%arg0: i32) -> (i32, i32, i32) {
    %c0_i32 = arith.constant 0 : i32
    %c0_i32_0 = arith.constant 0 : i32
    %c0_i32_1 = arith.constant 0 : i32
    return %arg0, %c0_i32, %c0_i32_0 : i32, i32, i32
  }
  func.func @transform_1(%arg0: i32) -> (i32, i32, i32) {
    %c0_i32 = arith.constant 0 : i32
    %c0_i32_0 = arith.constant 0 : i32
    %c0_i32_1 = arith.constant 0 : i32
    return %arg0, %c0_i32, %c0_i32_0 : i32, i32, i32
  }
  func.func @transform_2(%arg0: i32) -> (i32, i32) {
    %c0_i32 = arith.constant 0 : i32
    %c0_i32_0 = arith.constant 0 : i32
    %c0_i32_1 = arith.constant 0 : i32
    return %c0_i32, %c0_i32_0 : i32, i32
  }
  func.func @transform_3(%arg0: i32) -> (i32, i32, i32) {
    %c0_i32 = arith.constant 0 : i32
    %c0_i32_0 = arith.constant 0 : i32
    %c0_i32_1 = arith.constant 0 : i32
    return %arg0, %c0_i32, %c0_i32_0 : i32, i32, i32
  }
}

</mosaic_0001>

<bundles_post_ra>
// kernel: tpu_custom_call.1
= control target key start
LH: loop header
LB: loop body
LE: loop exit
PB: predicated region body
PF: predicated region fallthrough
CT: control target
= control target key end

     0   :  { %8 = vsyncpa [#allocation3], 0  ;;  %s872_s0 = inlined_call_operand.vmem [shape: f32[8,8,256], index: 0, kind: input, shape index: {}]   ;;  %s873_s1 = inlined_call_operand.vmem [shape: f32[8,8,256], index: 1, kind: input, shape index: {}]   ;;  %s874_s2 = inlined_call_operand.vmem [shape: f32[256,64], index: 2, kind: input, shape index: {}]   ;;  %s875_s3 = inlined_call_operand.hbm [shape: f32[2,4,64], index: 3, kind: output, shape index: {}]  }
   0x1   :  { %10 = vsyncpa [#allocation3 + $0x1], 0  ;;  %s661_s12 = smov 0   ;;  %s663_s13 = smov 0  }
   0x2   :  { %s665_s14 = smov 0   ;;  %s667_s15 = smov 0  }
   0x3 LB: > { %s682_s16 = sadd.s32 4294967295, %s638_s15   ;;  %s487_s17 = sadd.s32 4294967294, %s638_s15   ;;  %s638_s15 = sphi %s667_s15, %s881_s15   ;;  %s634_s14 = sphi %s665_s14, %s880_s14   ;;  %s630_s13 = sphi %s663_s13, %s879_s13   ;;  %s626_s12 = sphi %s661_s12, %s878_s12  }
   0x4   : > { %s686_s18 = sadd.s32 1, %s638_s15   ;;  %s96_s19 = sadd.s32 1, %s634_s14 }
   0x5   : > { %s93_s20 = ssub.s32 %s638_s15, %s686_s18  ;;  %p106_p0 = scmp.ne.s32.totalorder %s634_s14, %s630_s13 }
   0x6   : > { %p94_p1 = scmp.eq.s32.totalorder %s93_s20, 0  ;;  %p107_p2 = scmp.eq.s32.totalorder %s682_s16, 1 }
   0x7   : > { %p112_p3 = scmp.ne.s32.totalorder %s630_s13, %s626_s12  ;;  %p113_p4 = scmp.eq.s32.totalorder %s487_s17, 1 }
   0x8   : > { %s697_s21 = scalar_select %p94_p1, %s634_s14, %s96_s19  }
   0x9   : > { %p699_p5 = por %p107_p2, %p106_p0  ;;  %p703_p6 = por %p113_p4, %p112_p3 }
   0xa   : > { %p490_p7 = scmp.ge.s32.totalorder %s638_s15, 1  ;;  %p154_p8 = scmp.lt.s32.totalorder %s638_s15, 3 }
   0xc   : > { %p155_p9 = pnand %p490_p7, %p154_p8 }
   0xd   : > { %s492_s30 = sshll.u32 (!%p155_p9), %s682_s16, 2  ;;  %s182_s25 = sand.u32 (!%p155_p9), 1, %s630_s13  }
   0xe   : > { %158 = sbr.rel (%p155_p9) target bundleno = 262 (0x106), region = 32  ;;  %p186_p10 = scmp.lt.s32.totalorder (!%p155_p9), %s492_s30, 7 }
   0xf   : > { %s491_s26 = sshll.u32 (!%p155_p9), %s182_s25, 2  ;;  %s499_s27 = sshll.u32 (!%p155_p9), %s682_s16, 6 }
  0x10   : > { %s184_s28 = scalar_lea.vmem (!%p155_p9), [#allocation2], %s491_s26  ;;  %s414_s5 = scalar_lea.hbm (!%p155_p9), %s875_s3, %s499_s27 }
  0x11   : > { %s403_s6 = scalar_lea.sflag (!%p155_p9), [#allocation3], %s182_s25 }
  0x13   : > { %v310_v0 = vld [vmem:[%s874_s2 + $0xf8] sm:$0xff]  ;;  %v309_v2 = vld [vmem:[%s874_s2 + $0xf0] sm:$0xff]  ;;  %v308_v4 = vld [vmem:[%s874_s2 + $0xe8] sm:$0xff]  ;;  %s883_s30 = smov (!%p186_p10, %s492_s30), 7  ;;  %vm319_vm0 = vcmask 1041409   ;;  %vm321_vm1 = vcmask 1042434  }
  0x14   : > { %v294_v1 = vld [vmem:[%s874_s2 + $0x78] sm:$0xff]  ;;  %504 = vmatprep.subr.mxu0 %v310_v0  ;;  %v293_v3 = vld [vmem:[%s874_s2 + $0x70] sm:$0xff]  ;;  %v292_v5 = vld [vmem:[%s874_s2 + $0x68] sm:$0xff]  ;;  %s502_s20 = sshll.u32 %s883_s30, 4  ;;  %vm323_vm2 = vcmask 1043459   ;;  %vm400_vm3 = vcmask 519168  }
  0x15   : > { %505 = vmatpush3.msra.mxu0 %v294_v1  ;;  %v307_v6 = vld [vmem:[%s874_s2 + $0xe0] sm:$0xff]  ;;  %v306_v8 = vld [vmem:[%s874_s2 + $0xd8] sm:$0xff]  ;;  %s743_s4 = scalar_lea.vmem %s872_s0, %s502_s20  ;;  %v305_v10 = vld [vmem:[%s874_s2 + $0xd0] sm:$0xff]  ;;  %s757_s17 = scalar_lea.vmem %s873_s1, %s502_s20 }
  0x16   : > { %506 = vmatprep.subr.mxu0 %v309_v2  ;;  %v291_v7 = vld [vmem:[%s874_s2 + $0x60] sm:$0xff]  ;;  %v290_v9 = vld [vmem:[%s874_s2 + $0x58] sm:$0xff]  ;;  %v289_v11 = vld [vmem:[%s874_s2 + $0x50] sm:$0xff]  ;;  %s416_s20 = sshll.u32 %s184_s28, 4  ;;  %s417_s20 = int_to_ptr.vmem [resolvable:$true] %s416_s20 }
  0x17   : > { %507 = vmatpush3.msra.mxu0 %v293_v3  ;;  %v304_v12 = vld [vmem:[%s874_s2 + $0xc8] sm:$0xff]  ;;  %v303_v14 = vld [vmem:[%s874_s2 + $0xc0] sm:$0xff]  ;;  %v202_v17 = vld [vmem:[%s743_s4 + $0x18] sm:$0xff]  ;;  %s578_s7 = scalar_lea.vmem %s417_s20, 64 }
  0x18   : > { %508 = vmatprep.subr.mxu0 %v308_v4  ;;  %v288_v13 = vld [vmem:[%s874_s2 + $0x48] sm:$0xff]  ;;  %v287_v16 = vld [vmem:[%s874_s2 + $0x40] sm:$0xff]  ;;  %v206_v19 = vld [vmem:[%s743_s4 + $0x38] sm:$0xff]  ;;  %v218_v25 = vadd.f32 1.0, %v202_v17  ;;  %p579_p11 = scmp.ne.s32.totalorder %s417_s20, %s578_s7 }
  0x19   : > { %509 = vmatpush3.msra.mxu0 %v292_v5  ;;  %v200_v15 = vld [vmem:[%s743_s4 + $0x8] sm:$0xff]  ;;  %v302_v21 = vld [vmem:[%s874_s2 + $0xb8] sm:$0xff]  ;;  %v222_v27 = vadd.f32 1.0, %v206_v19  ;;  %v199_v31 = vld [vmem:[%s743_s4] sm:$0xff] }
  0x1a   : > { %510 = vmatprep.subr.mxu0 %v307_v6  ;;  %v204_v18 = vld [vmem:[%s743_s4 + $0x28] sm:$0xff]  ;;  %v216_v20 = vadd.f32 1.0, %v200_v15  ;;  %v210_v23 = vld [vmem:[%s757_s17 + $0x18] sm:$0xff]  ;;  %v201_v32 = vld [vmem:[%s743_s4 + $0x10] sm:$0xff]  ;;  %v215_v39 = vadd.f32 1.0, %v199_v31  ;;  %p580_p12 = pnand %p579_p11, %p699_p5 }
  0x1b   : > { %511 = vmatpush3.msra.mxu0 %v291_v7  ;;  %v208_v22 = vld [vmem:[%s757_s17 + $0x8] sm:$0xff]  ;;  %v220_v26 = vadd.f32 1.0, %v204_v18  ;;  %v286_v28 = vld [vmem:[%s874_s2 + $0x38] sm:$0xff]  ;;  %v226_v33 = vmul.f32 %v218_v25, %v210_v23  ;;  %v203_v36 = vld [vmem:[%s743_s4 + $0x20] sm:$0xff]  ;;  %v217_v44 = vadd.f32 1.0, %v201_v32 }
  0x1c   : > { %512 = vmatprep.subr.mxu0 %v306_v8  ;;  %v212_v24 = vld [vmem:[%s757_s17 + $0x28] sm:$0xff]  ;;  %v214_v29 = vld [vmem:[%s757_s17 + $0x38] sm:$0xff]  ;;  %v224_v30 = vmul.f32 %v216_v20, %v208_v22  ;;  %v205_v37 = vld [vmem:[%s743_s4 + $0x30] sm:$0xff]  ;;  %v219_v45 = vadd.f32 1.0, %v203_v36  ;;  %p581_p13 = pneg %p580_p12  ;;  %s640_s4 = smov [#allocation2]  }
  0x1d   : > { %513 = vmatpush3.msra.mxu0 %v290_v9  ;;  %v228_v34 = vmul.f32 %v220_v26, %v212_v24  ;;  %v230_v35 = vmul.f32 %v222_v27, %v214_v29  ;;  %v207_v38 = vld [vmem:[%s757_s17] sm:$0xff]  ;;  %v209_v41 = vld [vmem:[%s757_s17 + $0x10] sm:$0xff]  ;;  %v249_v47 = vrot.slane %v226_v33, 4  ;;  %v221_v50 = vadd.f32 1.0, %v205_v37  ;;  %v300_v56 = vld [vmem:[%s874_s2 + $0xa8] sm:$0xff]  ;;  %s582_s8 = sshll.u32 %s640_s4, 4  ;;  %s583_s8 = int_to_ptr.vmem [resolvable:$false] %s582_s8 }
  0x1e   : > { %514 = vmatprep.subr.mxu0 %v305_v10  ;;  %v237_v40 = vrot.slane %v224_v30, 4  ;;  %v211_v42 = vld [vmem:[%s757_s17 + $0x20] sm:$0xff]  ;;  %v213_v43 = vld [vmem:[%s757_s17 + $0x30] sm:$0xff]  ;;  %v223_v53 = vmul.f32 %v215_v39, %v207_v38  ;;  %v225_v54 = vmul.f32 %v217_v44, %v209_v41  ;;  %v284_v61 = vld [vmem:[%s874_s2 + $0x28] sm:$0xff]  ;;  %s584_s16 = scalar_lea.vmem %s583_s8, 128  ;;  %p585_p0 = scmp.lt.s32.totalorder %s417_s20, %s583_s8 }
  0x1f   : > { %515 = vmatpush3.msra.mxu0 %v289_v11  ;;  %v301_v46 = vld [vmem:[%s874_s2 + $0xb0] sm:$0xff]  ;;  %v261_v48 = vrot.slane %v228_v34, 4  ;;  %v273_v49 = vrot.slane %v230_v35, 4  ;;  %v227_v55 = vmul.f32 %v219_v45, %v211_v42  ;;  %v250_v57 = vadd.f32 %v249_v47, %v226_v33  ;;  %v299_v2 = vld [vmem:[%s874_s2 + $0xa0] sm:$0xff]  ;;  %v282_v17 = vld [vmem:[%s874_s2 + $0x18] sm:$0xff]  ;;  %p586_p1 = scmp.lt.s32.totalorder %s584_s16, %s578_s7 }
  0x20   : > { %516 = vmatprep.subr.mxu0 %v304_v12  ;;  %v285_v51 = vld [vmem:[%s874_s2 + $0x30] sm:$0xff]  ;;  %v238_v52 = vadd.f32 %v237_v40, %v224_v30  ;;  %v229_v60 = vmul.f32 %v221_v50, %v213_v43  ;;  %v231_v63 = vrot.slane %v223_v53, 4  ;;  %v243_v0 = vrot.slane %v225_v54, 4  ;;  %v283_v7 = vld [vmem:[%s874_s2 + $0x20] sm:$0xff]  ;;  %v298_v12 = vld [vmem:[%s874_s2 + $0x98] sm:$0xff] }
  0x21   : > { %517 = vmatpush3.msra.mxu0 %v288_v13  ;;  %v262_v58 = vadd.f32 %v261_v48, %v228_v34  ;;  %v274_v59 = vadd.f32 %v273_v49, %v230_v35  ;;  %v255_v1 = vrot.slane %v227_v55, 4  ;;  %v251_v3 = vrot.slane %v250_v57, 2  ;;  %v297_v22 = vld [vmem:[%s874_s2 + $0x90] sm:$0xff]  ;;  %v296_v32 = vld [vmem:[%s874_s2 + $0x88] sm:$0xff]  ;;  %v295_v41 = vld [vmem:[%s874_s2 + $0x80] sm:$0xff]  ;;  %p587_p2 = por %p586_p1, %p585_p0 }
  0x22   : > { %518 = vmatprep.subr.mxu0 %v303_v14  ;;  %v239_v62 = vrot.slane %v238_v52, 2  ;;  %v267_v6 = vrot.slane %v229_v60, 4  ;;  %v232_v9 = vadd.f32 %v231_v63, %v223_v53  ;;  %v244_v10 = vadd.f32 %v243_v0, %v225_v54  ;;  %v281_v27 = vld [vmem:[%s874_s2 + $0x10] sm:$0xff]  ;;  %v280_v37 = vld [vmem:[%s874_s2 + $0x8] sm:$0xff]  ;;  %v279_v44 = vld [vmem:[%s874_s2] sm:$0xff] }
  0x23   : > { %519 = vmatpush3.msra.mxu0 %v287_v16  ;;  %v263_v4 = vrot.slane %v262_v58, 2  ;;  %v275_v5 = vrot.slane %v274_v59, 2  ;;  %v256_v11 = vadd.f32 %v255_v1, %v227_v55  ;;  %v252_v13 = vadd.f32 %v251_v3, %v250_v57  ;;  %p588_p3 = pnand %p587_p2, %p581_p13 }
  0x24   : > { %520 = vmatprep.subr.mxu0 %v302_v21  ;;  %v240_v8 = vadd.f32 %v239_v62, %v238_v52  ;;  %v268_v16 = vadd.f32 %v267_v6, %v229_v60  ;;  %v233_v19 = vrot.slane %v232_v9, 2  ;;  %v245_v20 = vrot.slane %v244_v10, 2 }
  0x25   : > { %521 = vmatpush3.msra.mxu0 %v286_v28  ;;  %v264_v14 = vadd.f32 %v263_v4, %v262_v58  ;;  %v276_v15 = vadd.f32 %v275_v5, %v274_v59  ;;  %v257_v21 = vrot.slane %v256_v11, 2  ;;  %v253_v23 = vrot.slane %v252_v13, 1 }
  0x26   : > { %522 = vmatprep.subr.mxu0 %v301_v46  ;;  %v241_v18 = vrot.slane %v240_v8, 1  ;;  %v269_v26 = vrot.slane %v268_v16, 2  ;;  %v234_v29 = vadd.f32 %v233_v19, %v232_v9  ;;  %v246_v30 = vadd.f32 %v245_v20, %v244_v10 }
  0x27   : > { %523 = vmatpush3.msra.mxu0 %v285_v51  ;;  %v265_v24 = vrot.slane %v264_v14, 1  ;;  %v277_v25 = vrot.slane %v276_v15, 1  ;;  %v258_v31 = vadd.f32 %v257_v21, %v256_v11  ;;  %v254_v33 = vadd.f32 %v253_v23, %v252_v13 }
  0x28   : > { %524 = vmatprep.subr.mxu0 %v300_v56  ;;  %v242_v28 = vadd.f32 %v241_v18, %v240_v8  ;;  %v270_v36 = vadd.f32 %v269_v26, %v268_v16  ;;  %v235_v38 = vrot.slane %v234_v29, 1  ;;  %v247_v39 = vrot.slane %v246_v30, 1 }
  0x29   : > { %525 = vmatpush3.msra.mxu0 %v284_v61  ;;  %v266_v34 = vadd.f32 %v265_v24, %v264_v14  ;;  %v278_v35 = vadd.f32 %v277_v25, %v276_v15  ;;  %v259_v40 = vrot.slane %v258_v31, 1 }
  0x2a   : > { %526 = vmatprep.subr.mxu0 %v299_v2  ;;  %v325_v42 = vsel %vm319_vm0, %v254_v33, %v242_v28  ;;  %v271_v43 = vrot.slane %v270_v36, 1  ;;  %v236_v46 = vadd.f32 %v235_v38, %v234_v29  ;;  %v248_v47 = vadd.f32 %v247_v39, %v246_v30 }
  0x2b   : > { %527 = vmatpush3.msra.mxu0 %v283_v7  ;;  %v326_v45 = vsel %vm321_vm1, %v266_v34, %v325_v42  ;;  %v260_v48 = vadd.f32 %v259_v40, %v258_v31 }
  0x2c   : > { %528 = vmatprep.subr.mxu0 %v298_v12  ;;  %v327_v49 = vsel %vm323_vm2, %v278_v35, %v326_v45  ;;  %v272_v50 = vadd.f32 %v271_v43, %v270_v36  ;;  %v320_v51 = vsel %vm319_vm0, %v248_v47, %v236_v46 }
  0x2d   : > { %529 = vmatpush3.msra.mxu0 %v282_v17  ;;  %394 = vmatprep.mubr.f32.mxu0 %v327_v49  ;;  %v322_v52 = vsel %vm321_vm1, %v260_v48, %v320_v51 }
  0x2e   : > { %530 = vmatprep.subr.mxu0 %v297_v22  ;;  %v324_v53 = vsel %vm323_vm2, %v272_v50, %v322_v52 }
  0x2f   : > { %531 = vmatpush3.msra.mxu0 %v281_v27 }
  0x30   : > { %532 = vmatprep.subr.mxu0 %v296_v32 }
  0x31   : > { %533 = vmatpush3.msra.mxu0 %v280_v37 }
  0x32   : > { %534 = vmatprep.subr.mxu0 %v295_v41 }
  0x33   : > { %535 = vmatpush3.msra.mxu0 %v279_v44 }
  0x34   : > { %395 = vmatmul.mubr.f32.vlgmr.msra.gmra.mxu0 %v324_v53 }
  0xf4   : > { %v536_v54 = vpop.f32.mrf.mxu0 }
  0xf6   : > { %v537_v55 = vpop.f32.mrf.mxu0 }
  0xf7   : > { %v538_v56 = vadd.f32 %v537_v55, %v536_v54 }
  0xf9   : > { %401 = vst.msk [vmem:[%s184_s28] sm:$0xf] %vm400_vm3, %v538_v56 }
  0xfa   : > { %591 = shalt.err (!%p588_p3)
}
  0xfb   : > { %s592_s9 = scalar_lea.hbm %s414_s5, 64  ;;  %s596_s17 = scalar_lea.hbm %s875_s3, 128 }
  0xfc   : > { %p593_p4 = scmp.ne.s32.totalorder %s414_s5, %s592_s9  ;;  %p597_p9 = scmp.lt.s32.totalorder %s414_s5, %s875_s3 }
  0xfd   : > { %p598_p10 = scmp.lt.s32.totalorder %s596_s17, %s592_s9 }
  0xfe   : > { %p594_p7 = pnand %p593_p4, %p699_p5 }
  0xff   : > { %p599_p11 = por %p598_p10, %p597_p9 }
 0x100   : > { %p595_p8 = pneg %p594_p7 }
 0x102   : > { %p600_p12 = pnand %p599_p11, %p595_p8 }
 0x104   : > { %603 = shalt.err (!%p600_p12)
}
 0x105   : > { %539 = dma.vmem_to_hbm [thread:$0]  (%p699_p5), %s417_s20, 64, %s414_s5, %s403_s6  }
 0x106 PF: > { %p545_p13 = scmp.ge.s32.totalorder %s638_s15, 2  ;;  %s428_s25 = sand.u32 1, %s626_s12  }
 0x107   : > { %s429_s26 = scalar_lea.sflag [#allocation3], %s428_s25 }
 0x108   : > { %p542_p0 = pnand %p545_p13, %p703_p6 }
 0x10a   : > { %p543_p1 = pneg %p542_p0 }
 0x10c   : > { %621 = dma.done.wait (%p543_p1), %s429_s26, 64  }
 0x10d   : > { %623 = vsyncadd (%p543_p1), %s429_s26, 4294967232  ;;  %p13_p2 = scmp.ge.s32.totalorder %s686_s18, 4   ;;  %s878_s12 = smov %s630_s13 }
 0x10e   : > { %s879_s13 = smov %s634_s14  ;;  %s880_s14 = smov %s697_s21 }
 0x10f   : > { %s881_s15 = smov %s686_s18  ;;  %15 = sbr.rel (!%p13_p2) target bundleno = 3 (0x3), region = 70 }
 0x114   :  { %434 = vsyncpa [#allocation3], 1 }
 0x115   :  { %436 = vsyncpa [#allocation3 + $0x1], 1 }

</bundles_post_ra>
